<compile_context>
chip_gen: v6e
topology: v6e:2x2x1
jax: 0.10.0
libtpu: 0.0.40
codegen_flags: <defaults>
</compile_context>

<pallas_src>
import jax
import jax.numpy as jnp
from jax.experimental import pallas as pl
from jax.experimental.pallas import tpu as pltpu


def linear_kernel(w_ref, b_ref, xt_ref, o_ref):
    """w_ref: SMEM (in,), b_ref: SMEM (1,), xt_ref: VMEM (in, tn), o_ref: VMEM (1, tn)."""
    in_features = xt_ref.shape[0]
    # Pure VPU multiply-add; SMEM scalars broadcast for free.
    y = xt_ref[0:1, :] * w_ref[0]
    for k in range(1, in_features):          # static (in_features == 2)
        y = y + xt_ref[k:k + 1, :] * w_ref[k]
    o_ref[...] = (y + b_ref[0]).astype(o_ref.dtype)


def _pick_batch_tile(n, max_tile=4096):
    """Largest power-of-two multiple of 128 that divides n (capped); else full n."""
    if n % 128 != 0:
        return n                              # full-array block (exempt from 8x128 rule)
    tn = 128
    while tn * 2 <= max_tile and n % (tn * 2) == 0:
        tn *= 2
    return tn


def linear_forward(x, w, b, *, max_tile=4096):
    """x: (N, in), w: (in, out=1), b: (out=1,) -> (N, 1)."""
    n, in_features = x.shape
    out_features = w.shape[1]
    assert out_features == 1, "kernel is specialized to Linear(in, 1)"

    xt = x.T                                  # (in, N)  lane-dense layout
    w_flat = w.reshape(in_features).astype(jnp.float32)   # (in,)  -> SMEM
    b_flat = b.reshape(out_features).astype(jnp.float32)  # (1,)   -> SMEM

    tn = _pick_batch_tile(n, max_tile=max_tile)
    grid = (n // tn,)

    yt = pl.pallas_call(
        linear_kernel,
        out_shape=jax.ShapeDtypeStruct((out_features, n), x.dtype),
        grid=grid,
        in_specs=[
            pl.BlockSpec(memory_space=pltpu.MemorySpace.SMEM),      # w scalars
            pl.BlockSpec(memory_space=pltpu.MemorySpace.SMEM),      # b scalar
            pl.BlockSpec((in_features, tn), lambda i: (0, i)),      # x^T, lane-dense
        ],
        out_specs=pl.BlockSpec((out_features, tn), lambda i: (0, i)),  # y as (1, tn)
        compiler_params=pltpu.CompilerParams(
            dimension_semantics=("parallel",),   # batch axis -> both TCs on v7x
        ),
    )(w_flat, b_flat, xt)

    return yt.T                               # back to (N, 1)


if __name__ == "__main__":
    key = jax.random.PRNGKey(0)
    kx, kw, kb, kx2 = jax.random.split(key, 4)

    n, in_features, out_features = 8, 2, 1

    # Deterministic "parameter init" mimicking torch.nn.Linear default
    # (uniform in [-1/sqrt(in), 1/sqrt(in)]).
    bound = 1.0 / (in_features ** 0.5)
    w = jax.random.uniform(kw, (in_features, out_features),
                           minval=-bound, maxval=bound, dtype=jnp.float32)
    b = jax.random.uniform(kb, (out_features,),
                           minval=-bound, maxval=bound, dtype=jnp.float32)

    # Small batch (single full block, no tiling).
    x = jax.random.normal(kx, (n, in_features), dtype=jnp.float32)
    y = linear_forward(x, w, b)
    jax.block_until_ready(y)
    y_ref = x @ w + b[None, :]
    assert y.shape == (n, out_features)
    assert jnp.allclose(y, y_ref, atol=1e-5), "mismatch vs reference (small batch)"

    # Larger batch exercising the lane-tiled, multi-step grid path.
    n_big = 2048
    x_big = jax.random.normal(kx2, (n_big, in_features), dtype=jnp.float32)
    y_big = linear_forward(x_big, w, b, max_tile=1024)   # grid=(2,)
    jax.block_until_ready(y_big)
    y_big_ref = x_big @ w + b[None, :]
    assert y_big.shape == (n_big, out_features)
    assert jnp.allclose(y_big, y_big_ref, atol=1e-5), "mismatch vs reference (large batch)"

    print("KERNEL_OK")
</pallas_src>

<mosaic_0001>
module attributes {stable_mosaic.version = 11 : i64} {
  func.func @linear_kernel(%arg0: i32, %arg1: memref<2xf32, #tpu.memory_space<smem>>, %arg2: memref<1xf32, #tpu.memory_space<smem>>, %arg3: memref<2x8xf32, #tpu.memory_space<vmem>>, %arg4: memref<1x8xf32, #tpu.memory_space<vmem>>) attributes {dimension_semantics = [#tpu.dimension_semantics<parallel>], iteration_bounds = array<i64: 1>, scalar_prefetch = 0 : i64, scratch_operands = 0 : i64, tpu.core_type = #tpu.core_type<tc>, window_params = [{transform_indices = @transform_0, window_bounds = array<i64: 2>}, {transform_indices = @transform_1, window_bounds = array<i64: 1>}, {transform_indices = @transform_2, window_bounds = array<i64: 2, 8>}, {transform_indices = @transform_3, window_bounds = array<i64: 1, 8>}]} {
    %c0 = arith.constant 0 : index
    %c0_0 = arith.constant 0 : index
    %0 = vector.load %arg3[%c0, %c0_0] : memref<2x8xf32, #tpu.memory_space<vmem>>, vector<1x8xf32>
    %c0_1 = arith.constant 0 : index
    %1 = memref.load %arg1[%c0_1] : memref<2xf32, #tpu.memory_space<smem>>
    %2 = vector.broadcast %1 : f32 to vector<1x8xf32>
    %3 = arith.mulf %0, %2 : vector<1x8xf32>
    %c1 = arith.constant 1 : index
    %c0_2 = arith.constant 0 : index
    %4 = vector.load %arg3[%c1, %c0_2] : memref<2x8xf32, #tpu.memory_space<vmem>>, vector<1x8xf32>
    %c1_3 = arith.constant 1 : index
    %5 = memref.load %arg1[%c1_3] : memref<2xf32, #tpu.memory_space<smem>>
    %6 = vector.broadcast %5 : f32 to vector<1x8xf32>
    %7 = arith.mulf %4, %6 : vector<1x8xf32>
    %8 = arith.addf %3, %7 : vector<1x8xf32>
    %c0_4 = arith.constant 0 : index
    %9 = memref.load %arg2[%c0_4] : memref<1xf32, #tpu.memory_space<smem>>
    %10 = vector.broadcast %9 : f32 to vector<1x8xf32>
    %11 = arith.addf %8, %10 : vector<1x8xf32>
    %c0_5 = arith.constant 0 : index
    %c0_6 = arith.constant 0 : index
    %12 = vector.load %arg4[%c0_5, %c0_6] : memref<1x8xf32, #tpu.memory_space<vmem>>, vector<1x8xf32>
    tpu.vector_store %arg4[%c0_5, %c0_6], %11 {strides = array<i32>} : memref<1x8xf32, #tpu.memory_space<vmem>>, vector<1x8xf32>,
    return
  }
  func.func @transform_0(%arg0: i32) -> i32 {
    %c0_i32 = arith.constant 0 : i32
    %c0_i32_0 = arith.constant 0 : i32
    return %c0_i32 : i32
  }
  func.func @transform_1(%arg0: i32) -> i32 {
    %c0_i32 = arith.constant 0 : i32
    %c0_i32_0 = arith.constant 0 : i32
    return %c0_i32 : i32
  }
  func.func @transform_2(%arg0: i32) -> (i32, i32) {
    %c0_i32 = arith.constant 0 : i32
    %c0_i32_0 = arith.constant 0 : i32
    return %c0_i32, %arg0 : i32, i32
  }
  func.func @transform_3(%arg0: i32) -> (i32, i32) {
    %c0_i32 = arith.constant 0 : i32
    %c0_i32_0 = arith.constant 0 : i32
    return %c0_i32, %arg0 : i32, i32
  }
}

</mosaic_0001>

<bundles_post_ra>
// kernel: tpu_custom_call.1
= control target key start
LH: loop header
LB: loop body
LE: loop exit
PB: predicated region body
PF: predicated region fallthrough
CT: control target
= control target key end

     0   :  { %9 = vsyncpa [#allocation5], 0  ;;  %s134_s0 = inlined_call_operand.vmem [shape: f32[2], index: 0, kind: input, shape index: {}]   ;;  %s135_s1 = inlined_call_operand.<no memory space> [shape: f32[1], index: 1, kind: input, shape index: {}]   ;;  %s136_s2 = inlined_call_operand.vmem [shape: f32[2,8], index: 2, kind: input, shape index: {}]   ;;  %s137_s3 = inlined_call_operand.hbm [shape: f32[1,8], index: 3, kind: output, shape index: {}]  }
   0x1   :  { %10 = vsyncpa [#allocation4], 0  ;;  %s17_s14 = sshll.u32 %s134_s0, 4  ;;  %s18_s14 = int_to_ptr.vmem [resolvable:$true] %s17_s14 }
   0x2   :  { %s61_s15 = scalar_lea.vmem %s18_s14, 16  ;;  %p66_p1 = scmp.lt.s32.totalorder %s18_s14, %s18_s14 }
   0x3   :  { %p62_p0 = scmp.ne.s32.totalorder %s18_s14, %s61_s15  ;;  %p67_p2 = scmp.lt.s32.totalorder %s61_s15, %s61_s15 }
   0x5   :  { %p68_p3 = por %p67_p2, %p66_p1 }
   0x7   :  { %p69_p4 = pnand %p68_p3, %p62_p0 }
   0x9   :  { %72 = shalt.err (!%p69_p4)
}
   0xa   :  { %s97_s16 = smov [#allocation3]  }
   0xb   :  { %20 = dma.vmem_to_smem %s18_s14, 16, %s97_s16, [#allocation5]  }
   0xc   :  { %93 = dma.done.wait [#allocation5], 16  }
   0xd   :  { %94 = vsyncadd [#allocation5], 4294967280 }
   0xe   :  { %28 = sfence }
   0xf   :  { %s30_s17 = sld [smem:[#allocation3]]  ;;  %v29_v0 = vld [vmem:[%s136_s2] sm:$0x1]  ;;  %v33_v1 = vld [vmem:[%s136_s2 + $0x1] sm:$0x1]  ;;  %v39_v6 = vstv %s135_s1  ;;  %s98_s24 = smov [#allocation6]  }
  0x10   :  { %s58_s18 = sld [smem:[#allocation3 + $0x1]]  ;;  %s49_s25 = sshll.u32 %s98_s24, 4  ;;  %vm41_vm0 = vcmask 57344   ;;  %s50_s25 = int_to_ptr.vmem [resolvable:$true] %s49_s25 }
  0x11   :  { %s73_s26 = scalar_lea.vmem %s50_s25, 16  ;;  %s77_s27 = scalar_lea.vmem %s50_s25, 32 }
  0x12   :  { %p74_p5 = scmp.ne.s32.totalorder %s50_s25, %s73_s26  ;;  %p78_p6 = scmp.lt.s32.totalorder %s50_s25, %s50_s25 }
  0x13   :  { %p79_p7 = scmp.lt.s32.totalorder %s77_s27, %s73_s26 }
  0x15   :  { %v31_v2 = vstv %s30_s17  ;;  %p80_p8 = por %p79_p7, %p78_p6 }
  0x16   :  { %v32_v3 = vmul.f32 %v31_v2, %v29_v0  ;;  %v35_v4 = vstv %s58_s18 }
  0x17   :  { %v36_v5 = vmul.f32 %v35_v4, %v33_v1  ;;  %p81_p9 = pnand %p80_p8, %p74_p5 }
  0x19   :  { %v37_v7 = vadd.f32 %v36_v5, %v32_v3 }
  0x1b   :  { %v40_v8 = vadd.f32 %v39_v6, %v37_v7 }
  0x1d   :  { %42 = vst.msk [vmem:[#allocation6] sm:$0x1] %vm41_vm0, %v40_v8 }
  0x1e   :  { %84 = shalt.err (!%p81_p9)
}
  0x1f   :  { %52 = dma.vmem_to_hbm [thread:$0]  %s50_s25, 16, %s137_s3, [#allocation4]  }
  0x20   :  { %95 = dma.done.wait [#allocation4], 16  }
  0x21   :  { %96 = vsyncadd [#allocation4], 4294967280 }
  0x22   :  { %56 = vsyncpa [#allocation4], 1 }
  0x23   :  { %57 = vsyncpa [#allocation5], 1 }

</bundles_post_ra>
